<compile_context>
chip_gen: v7x
topology: tpu7x:2x2x1
jax: 0.10.0
libtpu: 0.0.40
codegen_flags: <defaults>
</compile_context>

<pallas_src>
import numpy as np
import jax
import jax.numpy as jnp
from jax import lax
from jax.experimental import pallas as pl
from jax.experimental.pallas import tpu as pltpu


def _round_up(x: int, m: int) -> int:
    return ((x + m - 1) // m) * m


def _pick_tile(dim: int, candidates) -> int:
    for c in candidates:
        if dim % c == 0:
            return c
    return dim


def _vmem_capacity_bytes() -> int:
    """Physical VMEM per TensorCore (v5e/v6e: 128 MiB, v7x: 64 MiB)."""
    try:
        cap = int(pltpu.get_tpu_info().vmem_capacity_bytes)
        if cap > 0:
            return cap
    except Exception:
        pass
    return 64 * 2**20  # conservative fallback (v7x)


def _make_kernel(has_bias: bool, use_scratch: bool):
    """Grouped-GEMM tile kernel.

    refs: (gid_ref, x_ref, w_ref, [b_ref], o_ref, [acc_ref])
      x_ref: (tm, tk)    w_ref: (1, tn, tk)    b_ref: (1, 1, tn)
      o_ref: (tm, tn)    acc_ref: (tm, tn) f32 (only when use_scratch)
    When the output dtype is f32 the accumulation happens directly in o_ref
    (it is resident across the k grid axis), saving VMEM and a copy.
    """

    def kernel(gid_ref, x_ref, w_ref, *rest):
        if has_bias:
            b_ref, *rest = rest
        o_ref = rest[0]
        acc_ref = rest[1] if use_scratch else o_ref

        k = pl.program_id(2)

        @pl.when(k == 0)
        def _init():
            if has_bias:
                # fold bias into the accumulator init (saves a VPU pass)
                acc_ref[...] = jnp.broadcast_to(
                    b_ref[0].astype(jnp.float32), acc_ref.shape)
            else:
                acc_ref[...] = jnp.zeros_like(acc_ref)

        # contract the IN dims of x (tm,tk) and w (tn,tk) -> MXU, no .T relayout
        acc_ref[...] += lax.dot_general(
            x_ref[...],
            w_ref[0],
            dimension_numbers=(((1,), (1,)), ((), ())),
            preferred_element_type=jnp.float32,
        )

        if use_scratch:
            @pl.when(k == pl.num_programs(2) - 1)
            def _store():
                o_ref[...] = acc_ref[...].astype(o_ref.dtype)

    return kernel


def prepare_expert_params(weight, bias=None):
    """Pad expert weight [E,OUT,IN] (and bias [E,OUT]) to 128-multiples.

    Call ONCE at parameter-creation time so the per-call forward never has to
    materialize a padded copy of the full weight tensor through HBM.
    """
    E, OUT, IN = (int(s) for s in weight.shape)
    OUT_pad, IN_pad = _round_up(OUT, 128), _round_up(IN, 128)
    w = weight
    if (OUT_pad, IN_pad) != (OUT, IN):
        w = jnp.pad(weight, ((0, 0), (0, OUT_pad - OUT), (0, IN_pad - IN)))
    b = None
    if bias is not None:
        b = bias if OUT_pad == OUT else jnp.pad(bias, ((0, 0), (0, OUT_pad - OUT)))
    return w, b


def parameterized_experts_forward(x, weight, bias, expert_frequency, *,
                                  out_features=None):
    """Pallas equivalent of the torch fallback path in ParameterizedExperts.forward.

    x:                [T, in_features]  (tokens grouped/contiguous by expert)
    weight:           [E, out_features, in_features] (raw) or pre-padded via
                      prepare_expert_params (then pass out_features=true OUT)
    bias:             [E, out_features] (raw or pre-padded) or None
    expert_frequency: host-static int sequence of length E, sum == T
                      (matches the torch fallback's expert_frequency.tolist())
    """
    E = int(weight.shape[0])
    IN = int(x.shape[1])
    OUT = int(out_features) if out_features is not None else int(weight.shape[1])
    OUT_pad, IN_pad = _round_up(OUT, 128), _round_up(IN, 128)

    # TODO(synk): dynamic (device-side) expert_frequency with in-kernel ragged
    # addressing (megablox-gmm style masked partial tiles) to avoid per-routing
    # recompiles; the torch fallback path is itself host-static (.tolist()).
    freq = np.asarray(expert_frequency, dtype=np.int64)
    assert freq.shape == (E,)
    T = int(freq.sum())
    assert T == int(x.shape[0]), "expert_frequency must sum to the number of tokens"

    if T == 0:
        return jnp.zeros((0, OUT), dtype=x.dtype)

    # ---------------- weight / bias (prefer pre-padded params) ----------------
    w = weight
    if tuple(int(s) for s in w.shape[1:]) != (OUT_pad, IN_pad):
        assert tuple(int(s) for s in w.shape[1:]) == (OUT, IN), (
            "weight must be raw [E,OUT,IN] or pre-padded [E,OUT_pad,IN_pad]")
        # fallback: per-call padding (use prepare_expert_params to avoid this)
        w = jnp.pad(w, ((0, 0), (0, OUT_pad - OUT), (0, IN_pad - IN)))

    has_bias = bias is not None
    if has_bias:
        b = bias
        if int(b.shape[1]) != OUT_pad:
            b = jnp.pad(b, ((0, 0), (0, OUT_pad - int(b.shape[1]))))
        b = b.reshape(E, 1, OUT_pad)

    # ---------------- static schedule (host side) ----------------
    itemsize = jnp.dtype(x.dtype).itemsize
    w_itemsize = jnp.dtype(w.dtype).itemsize
    sub = max(8, 32 // itemsize)          # sublane multiple: 8 f32, 16 bf16, 32 int8

    nonempty = [e for e in range(E) if freq[e] > 0]
    max_freq = int(freq.max())
    avg_freq = T / max(1, len(nonempty))

    # M tile: up to 1024 (halves weight re-streaming + step overhead for big
    # experts), capped near 2*avg tokens/expert to limit padding under skew.
    tm = min(1024, max(sub, _round_up(max_freq, sub)))
    tm = min(tm, max(128, _round_up(max(1, int(2 * avg_freq)), sub)))
    tm = max(tm, sub)

    tn = _pick_tile(OUT_pad, (512, 256, 128))        # N tile (prefer 512)
    tk = _pick_tile(IN_pad, (512, 384, 256, 128))    # K tile (IN padded -> always hits)

    tiles_per_expert = {e: -(-int(freq[e]) // tm) for e in nonempty}
    num_m_tiles = sum(tiles_per_expert.values())
    M_pad = num_m_tiles * tm

    # per-M-tile expert id, scalar-prefetched into SMEM, read in index_maps
    group_ids = jnp.asarray(
        np.concatenate(
            [np.full(tiles_per_expert[e], e, dtype=np.int32) for e in nonempty]))

    # ---------------- glue: per-expert static slice + pad ----------------
    # TODO(synk): replace this extra HBM pass over x / out with in-kernel
    # ragged addressing (scalar-prefetched row offsets + masked stores).
    pad_cols = IN_pad - IN
    x_chunks = []
    start = 0
    for e in range(E):
        n = int(freq[e])
        if n > 0:
            xe = x[start:start + n]
            pad_rows = tiles_per_expert[e] * tm - n
            if pad_rows or pad_cols:
                xe = jnp.pad(xe, ((0, pad_rows), (0, pad_cols)))
            x_chunks.append(xe)
        start += n
    x_pad = x_chunks[0] if len(x_chunks) == 1 else jnp.concatenate(x_chunks, 0)

    # ---------------- pallas call ----------------
    out_dtype = x.dtype
    use_scratch = jnp.dtype(out_dtype) != jnp.dtype(jnp.float32)
    kernel = _make_kernel(has_bias, use_scratch)

    n_tiles = OUT_pad // tn
    k_tiles = IN_pad // tk
    grid = (num_m_tiles, n_tiles, k_tiles)

    x_spec = pl.BlockSpec((tm, tk), lambda i, j, k, gid: (i, k))
    w_spec = pl.BlockSpec((1, tn, tk), lambda i, j, k, gid: (gid[i], j, k))
    b_spec = pl.BlockSpec((1, 1, tn), lambda i, j, k, gid: (gid[i], 0, j))
    o_spec = pl.BlockSpec((tm, tn), lambda i, j, k, gid: (i, j))

    in_specs = [x_spec, w_spec] + ([b_spec] if has_bias else [])
    args = (group_ids, x_pad, w) + ((b,) if has_bias else ())
    scratch_shapes = [pltpu.VMEM((tm, tn), jnp.float32)] if use_scratch else []

    # HBM traffic: x re-read once per j pass, weights re-streamed per m-tile.
    flops = 2 * M_pad * OUT_pad * IN_pad
    bytes_accessed = (
        itemsize * M_pad * IN_pad * n_tiles
        + w_itemsize * num_m_tiles * OUT_pad * IN_pad
        + jnp.dtype(out_dtype).itemsize * M_pad * OUT_pad
        + (w_itemsize * num_m_tiles * OUT_pad if has_bias else 0))

    # double-buffered tiles (+ f32 accumulator when used); cap at physical VMEM
    working = (2 * tm * tk * itemsize
               + 2 * tn * tk * w_itemsize
               + 2 * tm * tn * jnp.dtype(out_dtype).itemsize
               + (2 * tn * w_itemsize if has_bias else 0)
               + (tm * tn * 4 if use_scratch else 0))
    vmem_cap = _vmem_capacity_bytes()
    vmem_limit = int(min(int(0.85 * vmem_cap), max(32 * 2**20, 3 * working)))

    # megacore split (v7x): few m-tiles -> shard N (halves per-TC weight
    # traffic); many m-tiles -> allow sharding M as well.
    if num_m_tiles >= 2 * n_tiles:
        dims = ("parallel", "parallel", "arbitrary")
    else:
        dims = ("arbitrary", "parallel", "arbitrary")

    out_pad = pl.pallas_call(
        kernel,
        out_shape=jax.ShapeDtypeStruct((M_pad, OUT_pad), out_dtype),
        grid_spec=pltpu.PrefetchScalarGridSpec(
            num_scalar_prefetch=1,
            grid=grid,
            in_specs=in_specs,
            out_specs=o_spec,
            scratch_shapes=scratch_shapes,
        ),
        compiler_params=pltpu.CompilerParams(
            dimension_semantics=dims,
            vmem_limit_bytes=vmem_limit,
        ),
        cost_estimate=pl.CostEstimate(
            flops=int(flops), transcendentals=0,
            bytes_accessed=int(bytes_accessed)),
    )(*args)

    # ---------------- un-pad: static per-expert slices, drop OUT padding -----
    out_chunks = []
    row = 0
    for e in nonempty:
        n = int(freq[e])
        out_chunks.append(out_pad[row:row + n, :OUT])
        row += tiles_per_expert[e] * tm
    return out_chunks[0] if len(out_chunks) == 1 else jnp.concatenate(out_chunks, 0)


if __name__ == "__main__":
    # small, deterministic setup consistent with the module's __init__
    num_experts = 4
    in_features = 32
    out_features = 64
    std = 0.02

    key = jax.random.PRNGKey(0)
    k_w, k_x = jax.random.split(key)

    # reset_parameters(): weight ~ N(0, std), bias zeroed
    weight = std * jax.random.normal(
        k_w, (num_experts, out_features, in_features), dtype=jnp.float32)
    bias = jnp.zeros((num_experts, out_features), dtype=jnp.float32)

    # tokens already grouped by expert (as the torch fallback path expects);
    # expert 2 gets zero tokens -> its weights are never touched by the kernel.
    expert_frequency = [3, 5, 0, 8]          # sums to 16 tokens
    T = int(sum(expert_frequency))
    x = jax.random.normal(k_x, (T, in_features), dtype=jnp.float32)

    # pure-JAX reference of the torch fallback path (split / linear / cat)
    chunks = []
    start = 0
    for e in range(num_experts):
        n = expert_frequency[e]
        chunks.append(x[start:start + n] @ weight[e].T + bias[e])
        start += n
    ref = jnp.concatenate(chunks, axis=0)

    # (1) bias path, params padded once at "parameter creation" time
    weight_p, bias_p = prepare_expert_params(weight, bias)
    out = parameterized_experts_forward(
        x, weight_p, bias_p, expert_frequency, out_features=out_features)
    out = jax.block_until_ready(out)
    assert out.shape == (T, out_features)
    np.testing.assert_allclose(np.asarray(out), np.asarray(ref), rtol=1e-5, atol=1e-5)

    # (2) no-bias path with raw (unpadded) params -> exercises in-call fallback
    out_nb = parameterized_experts_forward(x, weight, None, expert_frequency)
    out_nb = jax.block_until_ready(out_nb)
    np.testing.assert_allclose(np.asarray(out_nb), np.asarray(ref), rtol=1e-5, atol=1e-5)

    # (3) bf16 path -> exercises the f32 VMEM-scratch accumulator + cast store
    xb = x.astype(jnp.bfloat16)
    wb, bb = prepare_expert_params(weight.astype(jnp.bfloat16),
                                   bias.astype(jnp.bfloat16))
    out_bf = parameterized_experts_forward(
        xb, wb, bb, expert_frequency, out_features=out_features)
    out_bf = jax.block_until_ready(out_bf)
    assert out_bf.shape == (T, out_features) and out_bf.dtype == jnp.bfloat16
    np.testing.assert_allclose(np.asarray(out_bf.astype(jnp.float32)),
                               np.asarray(ref), rtol=3e-2, atol=1e-2)

    print("KERNEL_OK")
</pallas_src>

<mosaic_0001>
module attributes {stable_mosaic.version = 11 : i64} {
  func.func @kernel(%arg0: i32, %arg1: i32, %arg2: i32, %arg3: memref<3xi32, #tpu.memory_space<smem>>, %arg4: memref<8x128xf32, #tpu.memory_space<vmem>>, %arg5: memref<1x128x128xf32, #tpu.memory_space<vmem>>, %arg6: memref<1x1x128xf32, #tpu.memory_space<vmem>>, %arg7: memref<8x128xf32, #tpu.memory_space<vmem>>) attributes {dimension_semantics = [#tpu.dimension_semantics<parallel>, #tpu.dimension_semantics<parallel>, #tpu.dimension_semantics<arbitrary>], iteration_bounds = array<i64: 3, 1, 1>, scalar_prefetch = 1 : i64, scratch_operands = 0 : i64, tpu.core_type = #tpu.core_type<tc>, window_params = [{transform_indices = @transform_0, window_bounds = array<i64: 8, 128>}, {transform_indices = @transform_1, window_bounds = array<i64: 1, 128, 128>}, {transform_indices = @transform_2, window_bounds = array<i64: 1, 1, 128>}, {transform_indices = @transform_3, window_bounds = array<i64: 8, 128>}]} {
    %c0_i32 = arith.constant 0 : i32
    %0 = arith.cmpi eq, %arg2, %c0_i32 : i32
    %1 = arith.extui %0 : i1 to i32
    %c0_i32_0 = arith.constant 0 : i32
    %2 = arith.cmpi ne, %1, %c0_i32_0 : i32
    scf.if %2 {
      %c0_9 = arith.constant 0 : index
      %c0_10 = arith.constant 0 : index
      %c0_11 = arith.constant 0 : index
      %10 = vector.load %arg6[%c0_9, %c0_10, %c0_11] : memref<1x1x128xf32, #tpu.memory_space<vmem>>, vector<1x1x128xf32>
      %11 = vector.shape_cast %10 : vector<1x1x128xf32> to vector<1x128xf32>
      %12 = vector.shape_cast %11 : vector<1x128xf32> to vector<1x128xf32>
      %13 = vector.broadcast %12 : vector<1x128xf32> to vector<8x128xf32>
      %c0_12 = arith.constant 0 : index
      %c0_13 = arith.constant 0 : index
      %14 = vector.load %arg7[%c0_12, %c0_13] : memref<8x128xf32, #tpu.memory_space<vmem>>, vector<8x128xf32>
      tpu.vector_store %arg7[%c0_12, %c0_13], %13 {strides = array<i32>} : memref<8x128xf32, #tpu.memory_space<vmem>>, vector<8x128xf32>,
    } else {
    }
    %c0 = arith.constant 0 : index
    %c0_1 = arith.constant 0 : index
    %3 = vector.load %arg7[%c0, %c0_1] : memref<8x128xf32, #tpu.memory_space<vmem>>, vector<8x128xf32>
    %c0_2 = arith.constant 0 : index
    %c0_3 = arith.constant 0 : index
    %4 = vector.load %arg4[%c0_2, %c0_3] : memref<8x128xf32, #tpu.memory_space<vmem>>, vector<8x128xf32>
    %c0_4 = arith.constant 0 : index
    %c0_5 = arith.constant 0 : index
    %c0_6 = arith.constant 0 : index
    %5 = vector.load %arg5[%c0_4, %c0_5, %c0_6] : memref<1x128x128xf32, #tpu.memory_space<vmem>>, vector<1x128x128xf32>
    %6 = vector.shape_cast %5 : vector<1x128x128xf32> to vector<128x128xf32>
    %cst = arith.constant dense<0.000000e+00> : vector<8x128xf32>
    %7 = tpu.matmul %4, %6, %cst {dimension_numbers = #tpu.dot_dimension_numbers<[1], [1], [0], [0], [0, 0, 1, 0], [], []>} : vector<8x128xf32>, vector<128x128xf32>, vector<8x128xf32> -> vector<8x128xf32>
    %8 = arith.addf %3, %7 : vector<8x128xf32>
    %c0_7 = arith.constant 0 : index
    %c0_8 = arith.constant 0 : index
    %9 = vector.load %arg7[%c0_7, %c0_8] : memref<8x128xf32, #tpu.memory_space<vmem>>, vector<8x128xf32>
    tpu.vector_store %arg7[%c0_7, %c0_8], %8 {strides = array<i32>} : memref<8x128xf32, #tpu.memory_space<vmem>>, vector<8x128xf32>,
    return
  }
  func.func @transform_0(%arg0: i32, %arg1: i32, %arg2: i32, %arg3: memref<3xi32, #tpu.memory_space<smem>>) -> (i32, i32) {
    %c0_i32 = arith.constant 0 : i32
    return %arg0, %arg2 : i32, i32
  }
  func.func @transform_1(%arg0: i32, %arg1: i32, %arg2: i32, %arg3: memref<3xi32, #tpu.memory_space<smem>>) -> (i32, i32, i32) {
    %0 = arith.index_cast %arg0 : i32 to index
    %1 = memref.load %arg3[%0] : memref<3xi32, #tpu.memory_space<smem>>
    %c0_i32 = arith.constant 0 : i32
    return %1, %arg1, %arg2 : i32, i32, i32
  }
  func.func @transform_2(%arg0: i32, %arg1: i32, %arg2: i32, %arg3: memref<3xi32, #tpu.memory_space<smem>>) -> (i32, i32, i32) {
    %0 = arith.index_cast %arg0 : i32 to index
    %1 = memref.load %arg3[%0] : memref<3xi32, #tpu.memory_space<smem>>
    %c0_i32 = arith.constant 0 : i32
    %c0_i32_0 = arith.constant 0 : i32
    return %1, %c0_i32, %arg1 : i32, i32, i32
  }
  func.func @transform_3(%arg0: i32, %arg1: i32, %arg2: i32, %arg3: memref<3xi32, #tpu.memory_space<smem>>) -> (i32, i32) {
    %c0_i32 = arith.constant 0 : i32
    return %arg0, %arg1 : i32, i32
  }
}

</mosaic_0001>

<bundles_post_ra>
// kernel: tpu_custom_call.1
= control target key start
LH: loop header
LB: loop body
LE: loop exit
PB: predicated region body
PF: predicated region fallthrough
CT: control target
= control target key end

     0   :  { %s1295_s0 = inlined_call_operand.hbm [shape: s32[3], index: 0, kind: input, shape index: {}]   ;;  %s1296_s1 = inlined_call_operand.hbm [shape: f32[24,128], index: 1, kind: input, shape index: {}]   ;;  %s1297_s2 = inlined_call_operand.hbm [shape: f32[4,128,128], index: 2, kind: input, shape index: {}]   ;;  %s1298_s3 = inlined_call_operand.vmem [shape: f32[4,1,128], index: 3, kind: input, shape index: {}]   ;;  %s1299_s4 = inlined_call_operand.hbm [shape: f32[24,128], index: 4, kind: output, shape index: {}]  }
   0x1   :  { %1305 = sst [smem:[#allocation18_spill]] %s1296_s1  ;;  %s734_s17 = scalar_lea.hbm %s1295_s0, 16 }
   0x2   :  { %p735_p0 = scmp.ne.s32.totalorder %s1295_s0, %s734_s17  ;;  %p738_p1 = scmp.lt.u32.totalorder %s734_s17, %s1295_s0 }
   0x4   :  { %p740_p2 = pnand %p738_p1, %p735_p0 }
   0x6   :  { %743 = shalt.err (!%p740_p2)  }
   0x7   :  { %s918_s22 = smov [#allocation3]  }
   0x8   :  { %10 = dma.hbm_to_smem %s1295_s0, 16, %s918_s22, [#allocation2] }
   0x9   :  { %868 = dma.done.wait [#allocation2], 16 }
   0xa   :  { %869 = vsyncadd [#allocation2], 4294967280 }
   0xb   :  { %12 = sfence }
   0xc   :  { %13 = vsyncpa [#allocation5], 0 }
   0xd   :  { %15 = vsyncpa [#allocation5 + $0x1], 0 }
   0xe   :  { %16 = vsyncpa [#allocation8], 0 }
   0xf   :  { %18 = vsyncpa [#allocation8 + $0x1], 0 }
  0x10   :  { %19 = vsyncpa [#allocation6], 0 }
  0x11   :  { %21 = vsyncpa [#allocation6 + $0x1], 0  ;;  %s964_s25 = smov 0   ;;  %s966_s26 = smov 0  }
  0x12   :  { %s968_s27 = smov 0   ;;  %s970_s28 = smov 0  }
  0x13   :  { %s972_s29 = smov 0   ;;  %s974_s0 = smov 0  }
  0x14   :  { %s976_s30 = smov 0   ;;  %s978_s5 = smov 0  }
  0x15   :  { %s980_s6 = smov 0  }
  0x16 LB: > { %s538_s7 = sadd.s32 4294967295, %s916_s6   ;;  %s539_s8 = sadd.s32 4294967294, %s916_s6   ;;  %s916_s6 = sphi %s980_s6, %s27_s6   ;;  %s912_s5 = sphi %s978_s5, %s1337_s5   ;;  %s908_s30 = sphi %s976_s30, %s1336_s30   ;;  %s904_s0 = sphi %s974_s0, %s1335_s0   ;;  %s900_s29 = sphi %s972_s29, %s1334_s29   ;;  %s896_s28 = sphi %s970_s28, %s1333_s28   ;;  %s892_s27 = sphi %s968_s27, %s1332_s27   ;;  %s888_s26 = sphi %s966_s26, %s1331_s26   ;;  %s884_s25 = sphi %s964_s25, %s1330_s25  }
  0x17   : > { %s46_s9 = sadd.s32 1, %s912_s5  ;;  %s55_s10 = sadd.s32 1, %s904_s0 }
  0x18   : > { %p48_p3 = scmp.ge.s32.totalorder %s46_s9, 3  ;;  %p62_p4 = scmp.ne.s32.totalorder %s904_s0, %s900_s29 }
  0x19   : > { %p63_p5 = scmp.eq.s32.totalorder %s916_s6, 0  ;;  %p68_p6 = scmp.ne.s32.totalorder %s900_s29, %s896_s28 }
  0x1a   : > { %s1339_s9 = smov (%p48_p3, %s46_s9), 0  ;;  %p1029_p8 = scmp.eq.s32.totalorder %s538_s7, 0 }
  0x1b   : > { %1306 = sst [smem:[#allocation16_spill]] %s1339_s9  ;;  %p1025_p7 = por %p63_p5, %p62_p4 }
  0x1c   : > { %s50_s13 = ssub.s32 %s912_s5, %s1339_s9  ;;  %s78_s14 = sld [smem:[#allocation3 + %s912_s5]] }
  0x1d   : > { %p53_p9 = scmp.eq.s32.totalorder %s50_s13, 0  ;;  %p1041_p10 = por %p1029_p8, %p68_p6 }
  0x1e   : > { %s79_s16 = sld [smem:[#allocation3 + %s1339_s9]]  ;;  %s87_s17 = sadd.s32 1, %s892_s27 }
  0x1f   : > { %s1309_s15 = scalar_select %p1041_p10, 1, 0 }
  0x20   : > { %s1048_s18 = scalar_select %p53_p9, %s904_s0, %s55_s10  }
  0x21   : > { %p94_p11 = scmp.ne.s32.totalorder %s892_s27, %s888_s26  ;;  %p100_p12 = scmp.ne.s32.totalorder %s888_s26, %s884_s25 }
  0x22   : > { %1310 = sst [smem:[#allocation17_spill]] %s1048_s18  ;;  %p156_p13 = scmp.eq.s32.totalorder %s538_s7, 2 }
  0x23   : > { %p162_p0 = scmp.eq.s32.totalorder %s539_s8, 2  ;;  %p1056_p1 = por %p94_p11, %p63_p5 }
  0x24   : > { %p1062_p2 = por %p100_p12, %p1029_p8  ;;  %p1069_p3 = por %p156_p13, %p62_p4 }
  0x25   : > { %p1076_p9 = por %p162_p0, %p68_p6  ;;  %s80_s23 = ssub.s32 %s78_s14, %s79_s16 }
  0x26   : > { %s1312_s20 = scalar_select %p1062_p2, 1, 0 }
  0x27   : > { %s1313_s21 = scalar_select %p1069_p3, 1, 0 }
  0x28   : > { %s1314_s22 = scalar_select %p1076_p9, 1, 0 }
  0x29   : > { %p85_p5 = scmp.eq.s32.totalorder %s80_s23, 0  ;;  %p1301_p11 = scmp.lt.s32.totalorder %s916_s6, 3 }
  0x2a   : > { %s182_s24 = sand.u32 1, %s904_s0   ;;  %s543_s25 = sshll.u32 %s912_s5, 7 }
  0x2b   : > { %s1084_s7 = scalar_select %p85_p5, %s892_s27, %s87_s17  }
  0x2c   : > { %s542_s8 = sshll.u32 %s182_s24, 3  ;;  %s1315_s1 = sld [smem:[#allocation18_spill]] }
  0x2d   : > { %s186_s9 = scalar_lea.vmem [#allocation4], %s542_s8  ;;  %p1095_p4 = pnand %p1301_p11, %p1025_p7 }
  0x2e   : > { %s194_s18 = sshll.u32 %s186_s9, 4  ;;  %s183_s16 = scalar_lea.sflag [#allocation5], %s182_s24  ;;  %s1099_s18 = int_to_ptr.vmem [resolvable:$true] %s194_s18 }
  0x2f   : > { %p746_p13 = pneg %p1095_p4 }
  0x32   : > { %s1089_s13 = scalar_lea.hbm %s1315_s1, %s543_s25  ;;  %s749_s23 = scalar_lea.hbm %s1315_s1, 384 }
  0x33   : > { %s744_s17 = scalar_lea.hbm %s1089_s13, 128  ;;  %p750_p7 = scmp.lt.u32.totalorder %s1089_s13, %s1315_s1 }
  0x34   : > { %p745_p12 = scmp.ne.s32.totalorder %s1089_s13, %s744_s17  ;;  %p751_p11 = scmp.lt.u32.totalorder %s749_s23, %s744_s17 }
  0x35   : > { %p753_p8 = scmp.lt.u32.totalorder %s744_s17, %s1089_s13 }
  0x36   : > { %p747_p0 = pnand %p746_p13, %p745_p12  ;;  %p752_p6 = por %p751_p11, %p750_p7 }
  0x38   : > { %p748_p5 = pneg %p747_p0  ;;  %p754_p9 = por %p753_p8, %p752_p6 }
  0x3a   : > { %p755_p3 = pnand %p754_p9, %p748_p5 }
  0x3c   : > { %758 = shalt.err (!%p755_p3)
}
  0x3d   : > { %s759_s24 = scalar_lea.vmem %s1099_s18, 128  ;;  %s919_s10 = smov [#allocation4]  }
  0x3e   : > { %p760_p12 = scmp.ne.s32.totalorder %s1099_s18, %s759_s24  ;;  %s764_s12 = sshll.u32 %s919_s10, 4  ;;  %s765_s12 = int_to_ptr.vmem [resolvable:$false] %s764_s12 }
  0x3f   : > { %s766_s9 = scalar_lea.vmem %s765_s12, 256  ;;  %p767_p10 = scmp.lt.s32.totalorder %s1099_s18, %s765_s12 }
  0x40   : > { %p762_p0 = pnand %p760_p12, %p746_p13  ;;  %p768_p11 = scmp.lt.s32.totalorder %s766_s9, %s759_s24 }
  0x42   : > { %p763_p2 = pneg %p762_p0  ;;  %p769_p7 = por %p768_p11, %p767_p10 }
  0x44   : > { %p770_p6 = pnand %p769_p7, %p763_p2 }
  0x46   : > { %773 = shalt.err (!%p770_p6)
}
  0x47   : > { %644 = dma.hbm_to_vmem [thread:$0]  (!%p1095_p4), %s1089_s13, 128, %s1099_s18, %s183_s16  }
  0x48   : > { %p1317_p3 = scmp.lt.s32.totalorder %s916_s6, 4  ;;  %p1318_p9 = scmp.ge.s32.totalorder %s916_s6, 1 }
  0x49   : > { %s201_s14 = sand.u32 1, %s892_s27   ;;  %p1320_p2 = scmp.lt.s32.totalorder %s916_s6, 3 }
  0x4a   : > { %p1132_p10 = pnand %p1318_p9, %p1317_p3  ;;  %s544_s11 = sshll.u32 %s201_s14, 7 }
  0x4b   : > { %p1141_p8 = pnand %p1320_p2, %p1056_p1  ;;  %p1322_p4 = pmov %p1320_p2 }
  0x4c   : > { %s634_s25 = scalar_select %p1056_p1, [#allocation3], [#allocation10] }
  0x4d   : > { %s635_s18 = scalar_select %p1056_p1, %s912_s5, 0 }
  0x4e   : > { %s1341_s25 = smov (!%p1322_p4, %s634_s25), [#allocation11]  ;;  %p1323_p13 = pmov %p1320_p2 }
  0x4f   : > { %s205_s16 = scalar_lea.vmem [#allocation7], %s544_s11  ;;  %s1161_s19 = scalar_lea.sflag [#allocation8], %s201_s14 }
  0x50   : > { %s1343_s18 = smov (!%p1323_p13, %s635_s18), 0  ;;  %s216_s8 = sshll.u32 %s205_s16, 4  ;;  %s1154_s8 = int_to_ptr.vmem [resolvable:$true] %s216_s8 }
  0x51   : > { %s206_s13 = sld [smem:[%s1341_s25 + %s1343_s18]]  ;;  %p776_p5 = pneg %p1141_p8 }
  0x52   : > { %s779_s18 = scalar_lea.hbm %s1297_s2, 8192 }
  0x57   : > { %s556_s24 = sshll.u32 %s206_s13, 11 }
  0x58   : > { %s1159_s9 = scalar_lea.hbm %s1297_s2, %s556_s24 }
  0x59   : > { %s774_s1 = scalar_lea.hbm %s1159_s9, 2048  ;;  %p780_p11 = scmp.lt.u32.totalorder %s1159_s9, %s1297_s2 }
  0x5a   : > { %p775_p1 = scmp.ne.s32.totalorder %s1159_s9, %s774_s1  ;;  %p781_p7 = scmp.lt.u32.totalorder %s779_s18, %s774_s1 }
  0x5b   : > { %p783_p3 = scmp.lt.u32.totalorder %s774_s1, %s1159_s9 }
  0x5c   : > { %p777_p12 = pnand %p776_p5, %p775_p1  ;;  %p782_p6 = por %p781_p7, %p780_p11 }
  0x5e   : > { %p778_p0 = pneg %p777_p12  ;;  %p784_p9 = por %p783_p3, %p782_p6 }
  0x60   : > { %p785_p2 = pnand %p784_p9, %p778_p0 }
  0x62   : > { %788 = shalt.err (!%p785_p2)
}
  0x63   : > { %s789_s14 = scalar_lea.vmem %s1154_s8, 2048  ;;  %s920_s24 = smov [#allocation7]  }
  0x64   : > { %p790_p4 = scmp.ne.s32.totalorder %s1154_s8, %s789_s14  ;;  %s794_s10 = sshll.u32 %s920_s24, 4  ;;  %s795_s10 = int_to_ptr.vmem [resolvable:$false] %s794_s10 }
  0x65   : > { %s796_s12 = scalar_lea.vmem %s795_s10, 4096  ;;  %p797_p12 = scmp.lt.s32.totalorder %s1154_s8, %s795_s10 }
  0x66   : > { %p792_p13 = pnand %p790_p4, %p776_p5  ;;  %p798_p11 = scmp.lt.s32.totalorder %s796_s12, %s789_s14 }
  0x68   : > { %p793_p1 = pneg %p792_p13  ;;  %p799_p7 = por %p798_p11, %p797_p12 }
  0x6a   : > { %p800_p6 = pnand %p799_p7, %p793_p1 }
  0x6c   : > { %803 = shalt.err (!%p800_p6)
}
  0x6d   : > { %s921_s1 = smov 128   ;;  %s922_s11 = smov 8  }
  0x6e   : > { %649 = dma.hbm_to_vmem [thread:$0]  (!%p1141_p8), %s1159_s9, 2048, %s1154_s8, %s1161_s19, %s921_s1, %s921_s1, %s922_s11  }
  0x6f   : > { %239 = sbr.rel (%p1132_p10) target bundleno = 417 (0x1a1), region = 32  ;;  %s1192_s25 = sand.u32 (!%p1132_p10), 1, %s900_s29  }
  0x70   : > { %s548_s18 = sshll.u32 (!%p1132_p10), %s1192_s25, 3  ;;  %s242_s13 = scalar_lea.sflag (!%p1132_p10), [#allocation5], %s1192_s25 }
  0x71   : > { %s1198_s16 = scalar_lea.vmem (!%p1132_p10), [#allocation4], %s548_s18  ;;  %p1324_p5 = scmp.ne.s32.totalorder (!%p1132_p10), %s1309_s15, 0 }
  0x76   : > { %871 = dma.done.wait (%p1324_p5), %s242_s13, 128  }
  0x77   : > { %873 = vsyncadd (%p1324_p5), %s242_s13, 4294967168  ;;  %s250_s17 = sand.u32 1, %s888_s26   ;;  %p1325_p10 = scmp.ne.s32.totalorder %s1312_s20, 0 }
  0x78   : > { %s549_s23 = sshll.u32 %s250_s17, 7  ;;  %s251_s8 = scalar_lea.sflag [#allocation8], %s250_s17 }
  0x79   : > { %s1205_s9 = scalar_lea.vmem [#allocation7], %s549_s23 }
  0x7a   : > { %875 = dma.done.wait (%p1325_p10), %s251_s8, 2048  }
  0x7b   : > { %877 = vsyncadd (%p1325_p10), %s251_s8, 4294965248  ;;  %v923_v0 = vmov 0.0|0.0   ;;  %vm924_vm0 = vmmov 0   ;;  %v925_v1 = vmov 0.0   ;;  %v313_v2 = vld [vmem:[%s1205_s9] sm:$0xff]  ;;  %v314_v3 = vld [vmem:[%s1205_s9 + $0x8] sm:$0xff] }
  0x7c   : > { %609 = vmatprep.subr.bf16.mxu0 %v923_v0  ;;  %606 = vmatprep.mubr.msk.f32.mxu0 %vm924_vm0, %v925_v1  ;;  %v610_v4 = vpack.c.bf16 %v314_v3, %v313_v2  ;;  %v315_v5 = vld [vmem:[%s1205_s9 + $0x10] sm:$0xff]  ;;  %v316_v6 = vld [vmem:[%s1205_s9 + $0x18] sm:$0xff]  ;;  %v317_v8 = vld [vmem:[%s1205_s9 + $0x20] sm:$0xff]  ;;  %s291_s15 = sld [smem:[#allocation3 + %s908_s30]]  ;;  %s553_s24 = sshll.u32 %s908_s30, 7 }
  0x7d   : > { %v613_v7 = vpack.c.bf16 %v316_v6, %v315_v5  ;;  %v318_v9 = vld [vmem:[%s1205_s9 + $0x28] sm:$0xff]  ;;  %v319_v11 = vld [vmem:[%s1205_s9 + $0x30] sm:$0xff]  ;;  %v320_v12 = vld [vmem:[%s1205_s9 + $0x38] sm:$0xff]  ;;  %s288_s10 = scalar_lea.vmem [#allocation9], %s548_s18  ;;  %s1238_s13 = scalar_lea.hbm %s1299_s4, %s553_s24 }
  0x7e   : > { %611 = vmatpush3.bf16.xpose.msra.mxu0 %v610_v4  ;;  %v616_v10 = vpack.c.bf16 %v318_v9, %v317_v8  ;;  %v619_v13 = vpack.c.bf16 %v320_v12, %v319_v11  ;;  %v321_v14 = vld [vmem:[%s1205_s9 + $0x40] sm:$0xff]  ;;  %v322_v15 = vld [vmem:[%s1205_s9 + $0x48] sm:$0xff]  ;;  %v323_v17 = vld [vmem:[%s1205_s9 + $0x50] sm:$0xff]  ;;  %s416_s12 = sshll.u32 %s288_s10, 4  ;;  %p1326_p3 = scmp.ne.s32.totalorder %s1313_s21, 0  ;;  %s1240_s12 = int_to_ptr.vmem [resolvable:$true] %s416_s12 }
  0x7f   : > { %612 = vmatprep.subr.bf16.mxu0 %v923_v0  ;;  %v622_v16 = vpack.c.bf16 %v322_v15, %v321_v14  ;;  %v324_v18 = vld [vmem:[%s1205_s9 + $0x58] sm:$0xff]  ;;  %v325_v20 = vld [vmem:[%s1205_s9 + $0x60] sm:$0xff]  ;;  %v326_v21 = vld [vmem:[%s1205_s9 + $0x68] sm:$0xff]  ;;  %s804_s17 = scalar_lea.vmem %s1240_s12, 128  ;;  %s926_s30 = smov [#allocation9]  }
  0x80   : > { %v625_v19 = vpack.c.bf16 %v324_v18, %v323_v17  ;;  %v628_v22 = vpack.c.bf16 %v326_v21, %v325_v20  ;;  %v327_v23 = vld [vmem:[%s1205_s9 + $0x70] sm:$0xff]  ;;  %v328_v24 = vld [vmem:[%s1205_s9 + $0x78] sm:$0xff]  ;;  %p805_p0 = scmp.ne.s32.totalorder %s1240_s12, %s804_s17  ;;  %s808_s18 = sshll.u32 %s926_s30, 4  ;;  %s809_s18 = int_to_ptr.vmem [resolvable:$false] %s808_s18 }
  0x81   : > { %v631_v25 = vpack.c.bf16 %v328_v24, %v327_v23  ;;  %v312_v26 = vld [vmem:[%s1198_s16] sm:$0xff]  ;;  %s402_s16 = scalar_lea.sflag [#allocation6], %s1192_s25  ;;  %s810_s23 = scalar_lea.vmem %s809_s18, 256 }
  0x82   : > { %p292_p8 = scmp.lt.s32.totalorder %s291_s15, 3  ;;  %p806_p9 = pnand %p805_p0, %p1326_p3 }
  0x83   : > { %p811_p4 = scmp.lt.s32.totalorder %s1240_s12, %s809_s18  ;;  %p812_p13 = scmp.lt.s32.totalorder %s810_s23, %s804_s17 }
  0x84   : > { %s1345_s15 = smov (!%p292_p8, %s291_s15), 3  ;;  %p807_p2 = pneg %p806_p9 }
  0x85   : > { %s297_s14 = scalar_lea.vmem %s1298_s3, %s1345_s15  ;;  %p813_p1 = por %p812_p13, %p811_p4 }
  0x86   : > { %614 = vmatpush3.bf16.xpose.msra.mxu0 %v613_v7  ;;  %v551_v27 = vld [vmem:[%s297_s14] ss:$0 sm:$0xff] }
  0x87   : > { %615 = vmatprep.subr.bf16.mxu0 %v923_v0  ;;  %p814_p12 = pnand %p813_p1, %p807_p2 }
  0x8e   : > { %617 = vmatpush3.bf16.xpose.msra.mxu0 %v616_v10 }
  0x8f   : > { %618 = vmatprep.subr.bf16.mxu0 %v923_v0 }
  0x96   : > { %620 = vmatpush3.bf16.xpose.msra.mxu0 %v619_v13 }
  0x97   : > { %621 = vmatprep.subr.bf16.mxu0 %v923_v0 }
  0x9e   : > { %623 = vmatpush3.bf16.xpose.msra.mxu0 %v622_v16 }
  0x9f   : > { %624 = vmatprep.subr.bf16.mxu0 %v923_v0 }
  0xa6   : > { %626 = vmatpush3.bf16.xpose.msra.mxu0 %v625_v19 }
  0xa7   : > { %627 = vmatprep.subr.bf16.mxu0 %v923_v0 }
  0xae   : > { %629 = vmatpush3.bf16.xpose.msra.mxu0 %v628_v22 }
  0xaf   : > { %630 = vmatprep.subr.bf16.mxu0 %v923_v0 }
  0xb6   : > { %632 = vmatpush3.bf16.xpose.msra.mxu0 %v631_v25 }
  0xbd   : > { %607 = vmatmul.mubr.f32.vlgmr.msra.gmra.mrb[0].mxu0 %v312_v26 }
 0x190   : > { %v395_v28 = vpop.f32.mrb[0].mxu0 }
 0x191   : > { %v399_v29 = vadd.f32 %v551_v27, %v395_v28  ;;  %v608_v30 = vpop.f32.mrb[1].mxu0 }
 0x193   : > { %400 = vst [vmem:[%s288_s10] sm:$0xff] %v399_v29 }
 0x194   : > { %817 = shalt.err (!%p814_p12)
}
 0x195   : > { %s818_s25 = scalar_lea.hbm %s1238_s13, 128  ;;  %s822_s15 = scalar_lea.hbm %s1299_s4, 384 }
 0x196   : > { %p819_p11 = scmp.ne.s32.totalorder %s1238_s13, %s818_s25  ;;  %p823_p5 = scmp.lt.u32.totalorder %s1238_s13, %s1299_s4 }
 0x197   : > { %p824_p10 = scmp.lt.u32.totalorder %s822_s15, %s818_s25  ;;  %p826_p0 = scmp.lt.u32.totalorder %s818_s25, %s1238_s13 }
 0x198   : > { %p820_p7 = pnand %p819_p11, %p1326_p3 }
 0x199   : > { %p825_p8 = por %p824_p10, %p823_p5 }
 0x19a   : > { %p821_p6 = pneg %p820_p7 }
 0x19b   : > { %p827_p9 = por %p826_p0, %p825_p8 }
 0x19d   : > { %p828_p2 = pnand %p827_p9, %p821_p6 }
 0x19f   : > { %831 = shalt.err (!%p828_p2)
}
 0x1a0   : > { %639 = dma.vmem_to_hbm [thread:$0]  (%p1326_p3), %s1240_s12, 128, %s1238_s13, %s402_s16  }
 0x1a1 PF: > { %p655_p4 = scmp.ge.s32.totalorder %s916_s6, 2  ;;  %s428_s14 = sand.u32 1, %s896_s28  }
 0x1a2   : > { %p1327_p13 = scmp.ne.s32.totalorder %s1314_s22, 0  ;;  %s429_s24 = scalar_lea.sflag [#allocation6], %s428_s14 }
 0x1a4   : > { %p651_p1 = pnand %p655_p4, %p1327_p13 }
 0x1a6   : > { %879 = dma.done.wait (!%p651_p1), %s429_s24, 128  }
 0x1a7   : > { %881 = vsyncadd (!%p651_p1), %s429_s24, 4294967168  ;;  %s27_s6 = sadd.s32 1, %s916_s6   ;;  %s1328_s21 = sld [smem:[#allocation17_spill]] }
 0x1a8   : > { %p24_p12 = scmp.ge.s32.totalorder %s27_s6, 5   ;;  %s1329_s10 = sld [smem:[#allocation16_spill]] }
 0x1a9   : > { %s1330_s25 = smov %s888_s26  ;;  %s1331_s26 = smov %s892_s27 }
 0x1aa   : > { %s1332_s27 = smov %s1084_s7  ;;  %s1333_s28 = smov %s900_s29 }
 0x1ab   : > { %s1334_s29 = smov %s904_s0  ;;  %s1336_s30 = smov %s912_s5 }
 0x1ac   :  { %26 = sbr.rel (!%p24_p12) target bundleno = 22 (0x16), region = 97 }
 0x1ad   : > { %s1335_s0 = smov %s1328_s21 }
 0x1ae   : > { %s1337_s5 = smov %s1329_s10 }
 0x1b3   :  { %434 = vsyncpa [#allocation5], 1 }
 0x1b4   :  { %436 = vsyncpa [#allocation5 + $0x1], 1 }
 0x1b5   :  { %437 = vsyncpa [#allocation8], 1 }
 0x1b6   :  { %439 = vsyncpa [#allocation8 + $0x1], 1 }
 0x1b7   :  { %440 = vsyncpa [#allocation6], 1 }
 0x1b8   :  { %442 = vsyncpa [#allocation6 + $0x1], 1 }

</bundles_post_ra>
